<compile_context>
chip_gen: v6e
topology: v6e:2x2x1
jax: 0.10.0
libtpu: 0.0.40
codegen_flags: <defaults>
</compile_context>

<pallas_src>
import math
import functools

import jax
import jax.numpy as jnp
from jax.experimental import pallas as pl
from jax.experimental.pallas import tpu as pltpu


# ----------------------------- kernel helpers ------------------------------


def _conv_block(h, w_ref, b_ref, sel_ref, activ):
    """Conv1d(stride 1, padding 0) + optional ReLU + MaxPool1d, channels-last.

    h:       (L_in, C_in) value for one batch element
    w_ref:   (K, C_in, C_out) ref  (tap-major; wrapper transposes PyTorch (C_out,C_in,K))
    b_ref:   (1, C_out) ref
    sel_ref: (p_len, out_len - pool_k + 1) 0/1 ref; row p selects window start p*stride
    """
    K = w_ref.shape[0]
    L_in = h.shape[0]
    out_len = L_in - K + 1

    # conv as K shifted matmuls: acc[l, :] = sum_k h[l+k, :] @ W_k
    acc = jnp.dot(h[0:out_len, :], w_ref[0], preferred_element_type=jnp.float32)
    for k in range(1, K):
        acc = acc + jnp.dot(h[k:k + out_len, :], w_ref[k],
                            preferred_element_type=jnp.float32)
    acc = acc + b_ref[...]
    if activ:
        acc = jnp.maximum(acc, 0.0)

    # MaxPool1d: running window max via pool_k shifted unit-stride slices, then a
    # stride-s downsample as a 0/1 selection matmul (keeps all accesses unit-stride).
    win_len = sel_ref.shape[1]
    pool_k = out_len - win_len + 1
    win = acc[0:win_len, :]
    for j in range(1, pool_k):
        win = jnp.maximum(win, acc[j:j + win_len, :])
    return jnp.dot(sel_ref[...], win, preferred_element_type=jnp.float32)


def _make_kernel(num_cnn, num_linear, activ):
    def kernel(*refs):
        x_ref, o_ref = refs[0], refs[-1]
        idx = 1
        h = x_ref[...]                                   # (L0, C0), one batch element

        for _ in range(num_cnn):
            w_ref, b_ref, sel_ref = refs[idx], refs[idx + 1], refs[idx + 2]
            idx += 3
            h = _conv_block(h, w_ref, b_ref, sel_ref, activ)

        # nn.Flatten + first Linear.  PyTorch flattens (C, L) channel-major; the
        # wrapper re-lays the first linear's weight as (L, C, N) so the flatten
        # never materializes in-kernel (no transpose/reshape needed).
        w0_ref, b0_ref = refs[idx], refs[idx + 1]
        idx += 2
        acc = b0_ref[...]                                # (1, N0)
        for l in range(h.shape[0]):
            acc = acc + jnp.dot(h[l:l + 1, :], w0_ref[l],
                                preferred_element_type=jnp.float32)
        if activ:
            acc = jnp.maximum(acc, 0.0)

        # remaining Linear layers (module applies ReLU after every linear)
        for _ in range(1, num_linear):
            w_ref, b_ref = refs[idx], refs[idx + 1]
            idx += 2
            acc = jnp.dot(acc, w_ref[...],
                          preferred_element_type=jnp.float32) + b_ref[...]
            if activ:
                acc = jnp.maximum(acc, 0.0)

        o_ref[...] = acc.astype(o_ref.dtype)
    return kernel


# ------------------------------- wrapper -----------------------------------


def _pool_select_matrix(p_len, win_len, stride, dtype=jnp.float32):
    rows = jnp.arange(p_len, dtype=jnp.int32)[:, None]
    cols = jnp.arange(win_len, dtype=jnp.int32)[None, :]
    return (cols == rows * stride).astype(dtype)


@functools.partial(jax.jit, static_argnames=("activ", "pool"))
def classifier_cnn1d_forward(x, conv_params, lin_params, *, activ=True, pool=(2, 2, 0)):
    """ClassifierCNN1D forward (inference).

    x:           (B, seq_len, L)  -- PyTorch Conv1d layout; channels = cfg.seq_len
    conv_params: [(weight (C_out, C_in, K), bias (C_out,)), ...]   (PyTorch layout)
    lin_params:  [(weight (N_out, N_in),   bias (N_out,)), ...]    (PyTorch layout)
    """
    pool_k, pool_s, pool_p = pool
    # TODO(synk): MaxPool1d padding > 0 (pad with -inf) not implemented in-kernel.
    assert pool_p == 0
    B, C, L = x.shape

    # channels-last: length on sublanes, channels on lanes (lane-dense matmuls)
    x_cl = jnp.transpose(x, (0, 2, 1)).astype(jnp.float32)

    inputs = [x_cl]
    in_specs = [pl.BlockSpec((None, L, C), lambda i: (i, 0, 0))]

    def _resident(arr):
        # full-array, VMEM-resident operand with a constant index map
        inputs.append(arr)
        zeros = (0,) * arr.ndim
        in_specs.append(pl.BlockSpec(arr.shape, lambda i, _z=zeros: _z))

    for (w, b) in conv_params:
        c_out, c_in, k = w.shape
        assert c_in == C
        # TODO(synk): Conv1d padding > 0 not implemented in-kernel (config uses padding=0).
        out_len = L - k + 1
        win_len = out_len - pool_k + 1
        p_len = (out_len - pool_k) // pool_s + 1
        _resident(jnp.transpose(w, (2, 1, 0)).astype(jnp.float32))   # (K, C_in, C_out)
        _resident(b.reshape(1, c_out).astype(jnp.float32))
        _resident(_pool_select_matrix(p_len, win_len, pool_s))
        L, C = p_len, c_out

    (w0, b0), rest = lin_params[0], lin_params[1:]
    n0 = w0.shape[0]
    assert w0.shape[1] == C * L, "flat_num mismatch with conv stack output"
    # fold PyTorch's channel-major Flatten into the weight layout: (L, C, N)
    _resident(jnp.transpose(w0.T.reshape(C, L, n0), (1, 0, 2)).astype(jnp.float32))
    _resident(b0.reshape(1, n0).astype(jnp.float32))
    n_out = n0
    for (w, b) in rest:
        n_out = w.shape[0]
        _resident(w.T.astype(jnp.float32))                           # (N_in, N_out)
        _resident(b.reshape(1, n_out).astype(jnp.float32))

    kernel = _make_kernel(len(conv_params), len(lin_params), activ)

    out = pl.pallas_call(
        kernel,
        out_shape=jax.ShapeDtypeStruct((B, 1, n_out), jnp.float32),
        grid=(B,),
        in_specs=in_specs,
        out_specs=pl.BlockSpec((None, 1, n_out), lambda i: (i, 0, 0)),
        compiler_params=pltpu.CompilerParams(
            dimension_semantics=("parallel",)),
    )(*inputs)
    return out.reshape(B, n_out)


# ------------------------- pure-JAX reference ------------------------------


def _reference_forward(x, conv_params, lin_params, *, activ=True, pool=(2, 2, 0)):
    pk, ps, _ = pool
    h = x                                                 # (B, C, L)
    for (w, b) in conv_params:
        k = w.shape[2]
        out_len = h.shape[-1] - k + 1
        y = b[None, :, None] + sum(
            jnp.einsum("bcl,oc->bol", h[:, :, j:j + out_len], w[:, :, j])
            for j in range(k))
        if activ:
            y = jnp.maximum(y, 0.0)
        p_len = (out_len - pk) // ps + 1
        h = jnp.stack([y[:, :, p * ps:p * ps + pk].max(axis=-1)
                       for p in range(p_len)], axis=-1)
    h = h.reshape(h.shape[0], -1)                         # nn.Flatten (channel-major)
    # F.dropout(training=False) == identity
    for (w, b) in lin_params:
        h = h @ w.T + b
        if activ:
            h = jnp.maximum(h, 0.0)
    return h


# --------------------------------- main -------------------------------------


if __name__ == "__main__":
    # cfg: seq_len=8 (Conv1d in-channels), spatial length 16, num_cnn=2,
    #      conv_io=[(8,16,3,0),(16,32,3,0)], pool=(2,2,0), flat_num=64,
    #      num_linear=2, linear_io=[(64,32),(32,10)], activ=True, dropout=True.
    B, seq_len, L0 = 2, 8, 16
    conv_io = [(seq_len, 16, 3, 0), (16, 32, 3, 0)]
    pool = (2, 2, 0)
    linear_io = [(64, 32), (32, 10)]

    key = jax.random.PRNGKey(0)
    keys = jax.random.split(key, 1 + 2 * len(conv_io) + 2 * len(linear_io))
    k_iter = iter(keys)

    x = jax.random.normal(next(k_iter), (B, seq_len, L0), dtype=jnp.float32)

    conv_params = []
    for (cin, cout, k, _pad) in conv_io:
        w = jax.random.normal(next(k_iter), (cout, cin, k), jnp.float32) / math.sqrt(cin * k)
        b = jax.random.normal(next(k_iter), (cout,), jnp.float32) * 0.05
        conv_params.append((w, b))

    lin_params = []
    for (nin, nout) in linear_io:
        w = jax.random.normal(next(k_iter), (nout, nin), jnp.float32) / math.sqrt(nin)
        b = jax.random.normal(next(k_iter), (nout,), jnp.float32) * 0.05
        lin_params.append((w, b))

    out = classifier_cnn1d_forward(x, conv_params, lin_params, activ=True, pool=pool)
    out = jax.block_until_ready(out)

    ref = _reference_forward(x, conv_params, lin_params, activ=True, pool=pool)
    assert out.shape == (B, linear_io[-1][1])
    assert jnp.allclose(out, ref, atol=1e-4, rtol=1e-4), (
        "max abs err %g" % float(jnp.max(jnp.abs(out - ref))))

    print("KERNEL_OK")
</pallas_src>

<mosaic_0001>
module attributes {stable_mosaic.version = 11 : i64} {
  func.func @kernel(%arg0: i32, %arg1: memref<1x16x8xf32, #tpu.memory_space<vmem>>, %arg2: memref<3x8x16xf32, #tpu.memory_space<vmem>>, %arg3: memref<1x16xf32, #tpu.memory_space<vmem>>, %arg4: memref<7x13xf32, #tpu.memory_space<vmem>>, %arg5: memref<3x16x32xf32, #tpu.memory_space<vmem>>, %arg6: memref<1x32xf32, #tpu.memory_space<vmem>>, %arg7: memref<2x4xf32, #tpu.memory_space<vmem>>, %arg8: memref<2x32x32xf32, #tpu.memory_space<vmem>>, %arg9: memref<1x32xf32, #tpu.memory_space<vmem>>, %arg10: memref<32x10xf32, #tpu.memory_space<vmem>>, %arg11: memref<1x10xf32, #tpu.memory_space<vmem>>, %arg12: memref<1x1x10xf32, #tpu.memory_space<vmem>>) attributes {dimension_semantics = [#tpu.dimension_semantics<parallel>], iteration_bounds = array<i64: 2>, scalar_prefetch = 0 : i64, scratch_operands = 0 : i64, tpu.core_type = #tpu.core_type<tc>, window_params = [{transform_indices = @transform_0, window_bounds = array<i64: 1, 16, 8>}, {pipeline_mode = #tpu.pipeline_mode<synchronous>, transform_indices = @transform_1, window_bounds = array<i64: 3, 8, 16>}, {pipeline_mode = #tpu.pipeline_mode<synchronous>, transform_indices = @transform_2, window_bounds = array<i64: 1, 16>}, {pipeline_mode = #tpu.pipeline_mode<synchronous>, transform_indices = @transform_3, window_bounds = array<i64: 7, 13>}, {pipeline_mode = #tpu.pipeline_mode<synchronous>, transform_indices = @transform_4, window_bounds = array<i64: 3, 16, 32>}, {pipeline_mode = #tpu.pipeline_mode<synchronous>, transform_indices = @transform_5, window_bounds = array<i64: 1, 32>}, {pipeline_mode = #tpu.pipeline_mode<synchronous>, transform_indices = @transform_6, window_bounds = array<i64: 2, 4>}, {pipeline_mode = #tpu.pipeline_mode<synchronous>, transform_indices = @transform_7, window_bounds = array<i64: 2, 32, 32>}, {pipeline_mode = #tpu.pipeline_mode<synchronous>, transform_indices = @transform_8, window_bounds = array<i64: 1, 32>}, {pipeline_mode = #tpu.pipeline_mode<synchronous>, transform_indices = @transform_9, window_bounds = array<i64: 32, 10>}, {pipeline_mode = #tpu.pipeline_mode<synchronous>, transform_indices = @transform_10, window_bounds = array<i64: 1, 10>}, {transform_indices = @transform_11, window_bounds = array<i64: 1, 1, 10>}]} {
    %c0 = arith.constant 0 : index
    %c0_0 = arith.constant 0 : index
    %c0_1 = arith.constant 0 : index
    %0 = vector.load %arg1[%c0, %c0_0, %c0_1] : memref<1x16x8xf32, #tpu.memory_space<vmem>>, vector<1x16x8xf32>
    %1 = vector.shape_cast %0 : vector<1x16x8xf32> to vector<16x8xf32>
    %2 = vector.extract_strided_slice %1 {offsets = [0, 0], sizes = [14, 8], strides = [1, 1]} : vector<16x8xf32> to vector<14x8xf32>
    %c0_2 = arith.constant 0 : index
    %c0_3 = arith.constant 0 : index
    %c0_4 = arith.constant 0 : index
    %3 = vector.load %arg2[%c0_2, %c0_3, %c0_4] : memref<3x8x16xf32, #tpu.memory_space<vmem>>, vector<1x8x16xf32>
    %4 = vector.shape_cast %3 : vector<1x8x16xf32> to vector<8x16xf32>
    %cst = arith.constant dense<0.000000e+00> : vector<14x16xf32>
    %5 = tpu.matmul %2, %4, %cst {dimension_numbers = #tpu.dot_dimension_numbers<[1], [0], [0], [1], [0, 0, 1, 1], [], []>} : vector<14x8xf32>, vector<8x16xf32>, vector<14x16xf32> -> vector<14x16xf32>
    %6 = vector.extract_strided_slice %1 {offsets = [1, 0], sizes = [14, 8], strides = [1, 1]} : vector<16x8xf32> to vector<14x8xf32>
    %c1 = arith.constant 1 : index
    %c0_5 = arith.constant 0 : index
    %c0_6 = arith.constant 0 : index
    %7 = vector.load %arg2[%c1, %c0_5, %c0_6] : memref<3x8x16xf32, #tpu.memory_space<vmem>>, vector<1x8x16xf32>
    %8 = vector.shape_cast %7 : vector<1x8x16xf32> to vector<8x16xf32>
    %cst_7 = arith.constant dense<0.000000e+00> : vector<14x16xf32>
    %9 = tpu.matmul %6, %8, %cst_7 {dimension_numbers = #tpu.dot_dimension_numbers<[1], [0], [0], [1], [0, 0, 1, 1], [], []>} : vector<14x8xf32>, vector<8x16xf32>, vector<14x16xf32> -> vector<14x16xf32>
    %10 = arith.addf %5, %9 : vector<14x16xf32>
    %11 = vector.extract_strided_slice %1 {offsets = [2, 0], sizes = [14, 8], strides = [1, 1]} : vector<16x8xf32> to vector<14x8xf32>
    %c2 = arith.constant 2 : index
    %c0_8 = arith.constant 0 : index
    %c0_9 = arith.constant 0 : index
    %12 = vector.load %arg2[%c2, %c0_8, %c0_9] : memref<3x8x16xf32, #tpu.memory_space<vmem>>, vector<1x8x16xf32>
    %13 = vector.shape_cast %12 : vector<1x8x16xf32> to vector<8x16xf32>
    %cst_10 = arith.constant dense<0.000000e+00> : vector<14x16xf32>
    %14 = tpu.matmul %11, %13, %cst_10 {dimension_numbers = #tpu.dot_dimension_numbers<[1], [0], [0], [1], [0, 0, 1, 1], [], []>} : vector<14x8xf32>, vector<8x16xf32>, vector<14x16xf32> -> vector<14x16xf32>
    %15 = arith.addf %10, %14 : vector<14x16xf32>
    %c0_11 = arith.constant 0 : index
    %c0_12 = arith.constant 0 : index
    %16 = vector.load %arg3[%c0_11, %c0_12] : memref<1x16xf32, #tpu.memory_space<vmem>>, vector<1x16xf32>
    %17 = vector.broadcast %16 : vector<1x16xf32> to vector<14x16xf32>
    %18 = arith.addf %15, %17 : vector<14x16xf32>
    %cst_13 = arith.constant 0.000000e+00 : f32
    %19 = vector.broadcast %cst_13 : f32 to vector<14x16xf32>
    %20 = arith.maximumf %18, %19 : vector<14x16xf32>
    %21 = vector.extract_strided_slice %20 {offsets = [0, 0], sizes = [13, 16], strides = [1, 1]} : vector<14x16xf32> to vector<13x16xf32>
    %22 = vector.extract_strided_slice %20 {offsets = [1, 0], sizes = [13, 16], strides = [1, 1]} : vector<14x16xf32> to vector<13x16xf32>
    %23 = arith.maximumf %21, %22 : vector<13x16xf32>
    %c0_14 = arith.constant 0 : index
    %c0_15 = arith.constant 0 : index
    %24 = vector.load %arg4[%c0_14, %c0_15] : memref<7x13xf32, #tpu.memory_space<vmem>>, vector<7x13xf32>
    %cst_16 = arith.constant dense<0.000000e+00> : vector<7x16xf32>
    %25 = tpu.matmul %24, %23, %cst_16 {dimension_numbers = #tpu.dot_dimension_numbers<[1], [0], [0], [1], [0, 0, 1, 1], [], []>} : vector<7x13xf32>, vector<13x16xf32>, vector<7x16xf32> -> vector<7x16xf32>
    %26 = vector.extract_strided_slice %25 {offsets = [0, 0], sizes = [5, 16], strides = [1, 1]} : vector<7x16xf32> to vector<5x16xf32>
    %c0_17 = arith.constant 0 : index
    %c0_18 = arith.constant 0 : index
    %c0_19 = arith.constant 0 : index
    %27 = vector.load %arg5[%c0_17, %c0_18, %c0_19] : memref<3x16x32xf32, #tpu.memory_space<vmem>>, vector<1x16x32xf32>
    %28 = vector.shape_cast %27 : vector<1x16x32xf32> to vector<16x32xf32>
    %cst_20 = arith.constant dense<0.000000e+00> : vector<5x32xf32>
    %29 = tpu.matmul %26, %28, %cst_20 {dimension_numbers = #tpu.dot_dimension_numbers<[1], [0], [0], [1], [0, 0, 1, 1], [], []>} : vector<5x16xf32>, vector<16x32xf32>, vector<5x32xf32> -> vector<5x32xf32>
    %30 = vector.extract_strided_slice %25 {offsets = [1, 0], sizes = [5, 16], strides = [1, 1]} : vector<7x16xf32> to vector<5x16xf32>
    %c1_21 = arith.constant 1 : index
    %c0_22 = arith.constant 0 : index
    %c0_23 = arith.constant 0 : index
    %31 = vector.load %arg5[%c1_21, %c0_22, %c0_23] : memref<3x16x32xf32, #tpu.memory_space<vmem>>, vector<1x16x32xf32>
    %32 = vector.shape_cast %31 : vector<1x16x32xf32> to vector<16x32xf32>
    %cst_24 = arith.constant dense<0.000000e+00> : vector<5x32xf32>
    %33 = tpu.matmul %30, %32, %cst_24 {dimension_numbers = #tpu.dot_dimension_numbers<[1], [0], [0], [1], [0, 0, 1, 1], [], []>} : vector<5x16xf32>, vector<16x32xf32>, vector<5x32xf32> -> vector<5x32xf32>
    %34 = arith.addf %29, %33 : vector<5x32xf32>
    %35 = vector.extract_strided_slice %25 {offsets = [2, 0], sizes = [5, 16], strides = [1, 1]} : vector<7x16xf32> to vector<5x16xf32>
    %c2_25 = arith.constant 2 : index
    %c0_26 = arith.constant 0 : index
    %c0_27 = arith.constant 0 : index
    %36 = vector.load %arg5[%c2_25, %c0_26, %c0_27] : memref<3x16x32xf32, #tpu.memory_space<vmem>>, vector<1x16x32xf32>
    %37 = vector.shape_cast %36 : vector<1x16x32xf32> to vector<16x32xf32>
    %cst_28 = arith.constant dense<0.000000e+00> : vector<5x32xf32>
    %38 = tpu.matmul %35, %37, %cst_28 {dimension_numbers = #tpu.dot_dimension_numbers<[1], [0], [0], [1], [0, 0, 1, 1], [], []>} : vector<5x16xf32>, vector<16x32xf32>, vector<5x32xf32> -> vector<5x32xf32>
    %39 = arith.addf %34, %38 : vector<5x32xf32>
    %c0_29 = arith.constant 0 : index
    %c0_30 = arith.constant 0 : index
    %40 = vector.load %arg6[%c0_29, %c0_30] : memref<1x32xf32, #tpu.memory_space<vmem>>, vector<1x32xf32>
    %41 = vector.broadcast %40 : vector<1x32xf32> to vector<5x32xf32>
    %42 = arith.addf %39, %41 : vector<5x32xf32>
    %cst_31 = arith.constant 0.000000e+00 : f32
    %43 = vector.broadcast %cst_31 : f32 to vector<5x32xf32>
    %44 = arith.maximumf %42, %43 : vector<5x32xf32>
    %45 = vector.extract_strided_slice %44 {offsets = [0, 0], sizes = [4, 32], strides = [1, 1]} : vector<5x32xf32> to vector<4x32xf32>
    %46 = vector.extract_strided_slice %44 {offsets = [1, 0], sizes = [4, 32], strides = [1, 1]} : vector<5x32xf32> to vector<4x32xf32>
    %47 = arith.maximumf %45, %46 : vector<4x32xf32>
    %c0_32 = arith.constant 0 : index
    %c0_33 = arith.constant 0 : index
    %48 = vector.load %arg7[%c0_32, %c0_33] : memref<2x4xf32, #tpu.memory_space<vmem>>, vector<2x4xf32>
    %cst_34 = arith.constant dense<0.000000e+00> : vector<2x32xf32>
    %49 = tpu.matmul %48, %47, %cst_34 {dimension_numbers = #tpu.dot_dimension_numbers<[1], [0], [0], [1], [0, 0, 1, 1], [], []>} : vector<2x4xf32>, vector<4x32xf32>, vector<2x32xf32> -> vector<2x32xf32>
    %c0_35 = arith.constant 0 : index
    %c0_36 = arith.constant 0 : index
    %50 = vector.load %arg9[%c0_35, %c0_36] : memref<1x32xf32, #tpu.memory_space<vmem>>, vector<1x32xf32>
    %51 = vector.extract_strided_slice %49 {offsets = [0, 0], sizes = [1, 32], strides = [1, 1]} : vector<2x32xf32> to vector<1x32xf32>
    %c0_37 = arith.constant 0 : index
    %c0_38 = arith.constant 0 : index
    %c0_39 = arith.constant 0 : index
    %52 = vector.load %arg8[%c0_37, %c0_38, %c0_39] : memref<2x32x32xf32, #tpu.memory_space<vmem>>, vector<1x32x32xf32>
    %53 = vector.shape_cast %52 : vector<1x32x32xf32> to vector<32x32xf32>
    %cst_40 = arith.constant dense<0.000000e+00> : vector<1x32xf32>
    %54 = tpu.matmul %51, %53, %cst_40 {dimension_numbers = #tpu.dot_dimension_numbers<[1], [0], [0], [1], [0, 0, 1, 1], [], []>} : vector<1x32xf32>, vector<32x32xf32>, vector<1x32xf32> -> vector<1x32xf32>
    %55 = arith.addf %50, %54 : vector<1x32xf32>
    %56 = vector.extract_strided_slice %49 {offsets = [1, 0], sizes = [1, 32], strides = [1, 1]} : vector<2x32xf32> to vector<1x32xf32>
    %c1_41 = arith.constant 1 : index
    %c0_42 = arith.constant 0 : index
    %c0_43 = arith.constant 0 : index
    %57 = vector.load %arg8[%c1_41, %c0_42, %c0_43] : memref<2x32x32xf32, #tpu.memory_space<vmem>>, vector<1x32x32xf32>
    %58 = vector.shape_cast %57 : vector<1x32x32xf32> to vector<32x32xf32>
    %cst_44 = arith.constant dense<0.000000e+00> : vector<1x32xf32>
    %59 = tpu.matmul %56, %58, %cst_44 {dimension_numbers = #tpu.dot_dimension_numbers<[1], [0], [0], [1], [0, 0, 1, 1], [], []>} : vector<1x32xf32>, vector<32x32xf32>, vector<1x32xf32> -> vector<1x32xf32>
    %60 = arith.addf %55, %59 : vector<1x32xf32>
    %cst_45 = arith.constant 0.000000e+00 : f32
    %61 = vector.broadcast %cst_45 : f32 to vector<1x32xf32>
    %62 = arith.maximumf %60, %61 : vector<1x32xf32>
    %c0_46 = arith.constant 0 : index
    %c0_47 = arith.constant 0 : index
    %63 = vector.load %arg10[%c0_46, %c0_47] : memref<32x10xf32, #tpu.memory_space<vmem>>, vector<32x10xf32>
    %cst_48 = arith.constant dense<0.000000e+00> : vector<1x10xf32>
    %64 = tpu.matmul %62, %63, %cst_48 {dimension_numbers = #tpu.dot_dimension_numbers<[1], [0], [0], [1], [0, 0, 1, 1], [], []>} : vector<1x32xf32>, vector<32x10xf32>, vector<1x10xf32> -> vector<1x10xf32>
    %c0_49 = arith.constant 0 : index
    %c0_50 = arith.constant 0 : index
    %65 = vector.load %arg11[%c0_49, %c0_50] : memref<1x10xf32, #tpu.memory_space<vmem>>, vector<1x10xf32>
    %66 = arith.addf %64, %65 : vector<1x10xf32>
    %cst_51 = arith.constant 0.000000e+00 : f32
    %67 = vector.broadcast %cst_51 : f32 to vector<1x10xf32>
    %68 = arith.maximumf %66, %67 : vector<1x10xf32>
    %c0_52 = arith.constant 0 : index
    %c0_53 = arith.constant 0 : index
    %c0_54 = arith.constant 0 : index
    %69 = vector.load %arg12[%c0_52, %c0_53, %c0_54] : memref<1x1x10xf32, #tpu.memory_space<vmem>>, vector<1x1x10xf32>
    %70 = vector.shape_cast %69 : vector<1x1x10xf32> to vector<1x10xf32>
    %71 = vector.shape_cast %68 : vector<1x10xf32> to vector<1x1x10xf32>
    tpu.vector_store %arg12[%c0_52, %c0_53, %c0_54], %71 {strides = array<i32>} : memref<1x1x10xf32, #tpu.memory_space<vmem>>, vector<1x1x10xf32>,
    return
  }
  func.func @transform_0(%arg0: i32) -> (i32, i32, i32) {
    %c0_i32 = arith.constant 0 : i32
    %c0_i32_0 = arith.constant 0 : i32
    %c0_i32_1 = arith.constant 0 : i32
    return %arg0, %c0_i32, %c0_i32_0 : i32, i32, i32
  }
  func.func @transform_1(%arg0: i32) -> (i32, i32, i32) {
    %c0_i32 = arith.constant 0 : i32
    %c0_i32_0 = arith.constant 0 : i32
    %c0_i32_1 = arith.constant 0 : i32
    %c0_i32_2 = arith.constant 0 : i32
    return %c0_i32, %c0_i32_0, %c0_i32_1 : i32, i32, i32
  }
  func.func @transform_2(%arg0: i32) -> (i32, i32) {
    %c0_i32 = arith.constant 0 : i32
    %c0_i32_0 = arith.constant 0 : i32
    %c0_i32_1 = arith.constant 0 : i32
    return %c0_i32, %c0_i32_0 : i32, i32
  }
  func.func @transform_3(%arg0: i32) -> (i32, i32) {
    %c0_i32 = arith.constant 0 : i32
    %c0_i32_0 = arith.constant 0 : i32
    %c0_i32_1 = arith.constant 0 : i32
    return %c0_i32, %c0_i32_0 : i32, i32
  }
  func.func @transform_4(%arg0: i32) -> (i32, i32, i32) {
    %c0_i32 = arith.constant 0 : i32
    %c0_i32_0 = arith.constant 0 : i32
    %c0_i32_1 = arith.constant 0 : i32
    %c0_i32_2 = arith.constant 0 : i32
    return %c0_i32, %c0_i32_0, %c0_i32_1 : i32, i32, i32
  }
  func.func @transform_5(%arg0: i32) -> (i32, i32) {
    %c0_i32 = arith.constant 0 : i32
    %c0_i32_0 = arith.constant 0 : i32
    %c0_i32_1 = arith.constant 0 : i32
    return %c0_i32, %c0_i32_0 : i32, i32
  }
  func.func @transform_6(%arg0: i32) -> (i32, i32) {
    %c0_i32 = arith.constant 0 : i32
    %c0_i32_0 = arith.constant 0 : i32
    %c0_i32_1 = arith.constant 0 : i32
    return %c0_i32, %c0_i32_0 : i32, i32
  }
  func.func @transform_7(%arg0: i32) -> (i32, i32, i32) {
    %c0_i32 = arith.constant 0 : i32
    %c0_i32_0 = arith.constant 0 : i32
    %c0_i32_1 = arith.constant 0 : i32
    %c0_i32_2 = arith.constant 0 : i32
    return %c0_i32, %c0_i32_0, %c0_i32_1 : i32, i32, i32
  }
  func.func @transform_8(%arg0: i32) -> (i32, i32) {
    %c0_i32 = arith.constant 0 : i32
    %c0_i32_0 = arith.constant 0 : i32
    %c0_i32_1 = arith.constant 0 : i32
    return %c0_i32, %c0_i32_0 : i32, i32
  }
  func.func @transform_9(%arg0: i32) -> (i32, i32) {
    %c0_i32 = arith.constant 0 : i32
    %c0_i32_0 = arith.constant 0 : i32
    %c0_i32_1 = arith.constant 0 : i32
    return %c0_i32, %c0_i32_0 : i32, i32
  }
  func.func @transform_10(%arg0: i32) -> (i32, i32) {
    %c0_i32 = arith.constant 0 : i32
    %c0_i32_0 = arith.constant 0 : i32
    %c0_i32_1 = arith.constant 0 : i32
    return %c0_i32, %c0_i32_0 : i32, i32
  }
  func.func @transform_11(%arg0: i32) -> (i32, i32, i32) {
    %c0_i32 = arith.constant 0 : i32
    %c0_i32_0 = arith.constant 0 : i32
    %c0_i32_1 = arith.constant 0 : i32
    return %arg0, %c0_i32, %c0_i32_0 : i32, i32, i32
  }
}

</mosaic_0001>

<bundles_post_ra>
// kernel: classifier_cnn1d_forward.1
= control target key start
LH: loop header
LB: loop body
LE: loop exit
PB: predicated region body
PF: predicated region fallthrough
CT: control target
= control target key end

     0   :  { %s1903_s0 = inlined_call_operand.vmem [shape: f32[2,16,8], index: 0, kind: input, shape index: {}]   ;;  %s1904_s1 = inlined_call_operand.vmem [shape: f32[3,8,16], index: 1, kind: input, shape index: {}]   ;;  %s1905_s2 = inlined_call_operand.vmem [shape: f32[1,16], index: 2, kind: input, shape index: {}]   ;;  %s1906_s3 = inlined_call_operand.vmem [shape: f32[7,13], index: 3, kind: input, shape index: {}]   ;;  %s1907_s4 = inlined_call_operand.vmem [shape: f32[3,16,32], index: 4, kind: input, shape index: {}]   ;;  %s1908_s5 = inlined_call_operand.vmem [shape: f32[1,32], index: 5, kind: input, shape index: {}]   ;;  %s1909_s6 = inlined_call_operand.vmem [shape: f32[2,4], index: 6, kind: input, shape index: {}]   ;;  %s1910_s7 = inlined_call_operand.vmem [shape: f32[2,32,32], index: 7, kind: input, shape index: {}]   ;;  %s1911_s8 = inlined_call_operand.vmem [shape: f32[1,32], index: 8, kind: input, shape index: {}]   ;;  %s1912_s9 = inlined_call_operand.vmem [shape: f32[32,10], index: 9, kind: input, shape index: {}]   ;;  %s1913_s10 = inlined_call_operand.vmem [shape: f32[1,10], index: 10, kind: input, shape index: {}]   ;;  %s1914_s11 = inlined_call_operand.hbm [shape: f32[2,1,10], index: 11, kind: output, shape index: {}]  }
   0x1   :  { %1915 = sst [smem:[#allocation5_spill]] %s1903_s0 }
   0x2   :  { %1916 = sst [smem:[#allocation6_spill]] %s1904_s1 }
   0x3   :  { %16 = vsyncpa [#allocation3], 0 }
   0x4   :  { %18 = vsyncpa [#allocation3 + $0x1], 0  ;;  %s1693_s17 = smov 0   ;;  %s1695_s18 = smov 0  }
   0x5   :  { %s1697_s19 = smov 0   ;;  %s1699_s20 = smov 0  }
   0x6 LB: > { %s1714_s21 = sadd.s32 4294967295, %s1628_s20   ;;  %s1370_s22 = sadd.s32 4294967294, %s1628_s20   ;;  %s1628_s20 = sphi %s1699_s20, %s1924_s20   ;;  %s1624_s19 = sphi %s1697_s19, %s1923_s19   ;;  %s1620_s18 = sphi %s1695_s18, %s1922_s18   ;;  %s1616_s17 = sphi %s1693_s17, %s1921_s17  }
   0x7   : > { %s1718_s23 = sadd.s32 1, %s1628_s20   ;;  %s267_s24 = sadd.s32 1, %s1624_s19 }
   0x8   : > { %s264_s25 = ssub.s32 %s1628_s20, %s1718_s23  ;;  %p277_p0 = scmp.ne.s32.totalorder %s1624_s19, %s1620_s18 }
   0x9   : > { %p265_p1 = scmp.eq.s32.totalorder %s264_s25, 0  ;;  %p278_p2 = scmp.eq.s32.totalorder %s1714_s21, 1 }
   0xa   : > { %p283_p3 = scmp.ne.s32.totalorder %s1620_s18, %s1616_s17  ;;  %p284_p4 = scmp.eq.s32.totalorder %s1370_s22, 1 }
   0xb   : > { %s1729_s26 = scalar_select %p265_p1, %s1624_s19, %s267_s24  }
   0xc   : > { %p1731_p5 = por %p278_p2, %p277_p0  ;;  %p1735_p6 = por %p284_p4, %p283_p3 }
   0xd   : > { %p1373_p7 = scmp.ge.s32.totalorder %s1628_s20, 1  ;;  %p340_p8 = scmp.lt.s32.totalorder %s1628_s20, 3 }
   0xf   : > { %p341_p9 = pnand %p1373_p7, %p340_p8 }
  0x10   : > { %s1919_s1 = sld [smem:[#allocation6_spill]] (!%p341_p9)  ;;  %p379_p10 = scmp.lt.s32.totalorder (!%p341_p9), %s1714_s21, 1 }
  0x11   : > { %344 = sbr.rel (%p341_p9) target bundleno = 1249 (0x4e1), region = 64  ;;  %s1920_s0 = sld [smem:[#allocation5_spill]] (!%p341_p9) }
  0x12   : > { %s1632_s24 = smov (!%p341_p9), [#allocation2]  }
  0x16   : > { %v1376_v0 = vld [vmem:[%s1919_s1 + $0x8] sm:$0xff]  ;;  %v386_v1 = vld [vmem:[%s1919_s1] sm:$0xff]  ;;  %v1381_v2 = vld [vmem:[%s1919_s1 + $0x10] sm:$0xff]  ;;  %s380_s16 = scalar_select %p379_p10, %s1714_s21, 1  ;;  %vm391_vm0 = vcmask 1046528   ;;  %vm395_vm1 = vcmask 64512  }
  0x17   : > { %1446 = vmatprep.subr.mxu1 %v1376_v0  ;;  %1456 = vmatprep.subr.mxu0 %v1381_v2  ;;  %vm556_vm2 = vcmask 1045504   ;;  %v1630_v11 = vmov 0.0   ;;  %vm1631_vm3 = vmmov 0   ;;  %v1384_v17 = vld [vmem:[%s1905_s2] ss:$0 sm:$0xff]  ;;  %vm666_vm4 = vcmask 1044480  }
  0x18   : > { %1447 = vmatpush3.msra.mxu1 %v1376_v0  ;;  %1457 = vmatpush3.msra.mxu0 %v1381_v2  ;;  %s1407_s22 = sshll.u32 %s380_s16, 4  ;;  %v661_v32 = vld [vmem:[%s1906_s3] sm:$0x7f]  ;;  %vm662_vm5 = vcmask 105472   ;;  %v741_v33 = vld [vmem:[%s1907_s4 + $0x8] sm:$0xff]  ;;  %v1388_v34 = vld [vmem:[%s1907_s4 + $0x18] sm:$0xff] }
  0x19   : > { %1451 = vmatprep.subr.mxu1 %v386_v1  ;;  %s383_s29 = scalar_lea.vmem %s1920_s0, %s1407_s22  ;;  %1468 = vmatprep.subr.mxu0 %v1630_v11  ;;  %v740_v35 = vld [vmem:[%s1907_s4] sm:$0xff]  ;;  %v1387_v36 = vld [vmem:[%s1907_s4 + $0x10] sm:$0xff]  ;;  %vm747_vm6 = vcmask 130048   ;;  %v1392_v39 = vld [vmem:[%s1907_s4 + $0x28] sm:$0xff]  ;;  %vm987_vm7 = vcmask 1043456   ;;  %vm983_vm8 = vcmask 31744  }
  0x1a   : > { %v384_v3 = vld [vmem:[%s383_s29] sm:$0xff]  ;;  %v385_v4 = vld [vmem:[%s383_s29 + $0x8] sm:$0xff]  ;;  %v1065_v43 = vld [vmem:[%s1910_s7 + $0x18] sm:$0xff]  ;;  %vm1066_vm9 = vcmask 261120   ;;  %s377_s22 = sand.u32 1, %s1620_s18   ;;  %s1404_s29 = sshll.u32 %s1714_s21, 4 }
  0x1b   : > { %v392_v5 = vrot.slane %v384_v3, 1  ;;  %v393_v6 = vrot.slane %v385_v4, 1  ;;  %v557_v7 = vrot.slane %v384_v3, 2  ;;  %v558_v8 = vrot.slane %v385_v4, 2  ;;  %v1391_v41 = vld [vmem:[%s1907_s4 + $0x20] sm:$0xff]  ;;  %v1064_v44 = vld [vmem:[%s1910_s7 + $0x10] sm:$0xff]  ;;  %s1313_s15 = scalar_lea.hbm %s1914_s11, %s1404_s29 }
  0x1c   : > { %v1063_v45 = vld [vmem:[%s1910_s7 + $0x8] sm:$0xff]  ;;  %v1394_v52 = vld [vmem:[%s1908_s5] ss:$0 sm:$0xff]  ;;  %v1401_v60 = vld [vmem:[%s1910_s7 + $0x38] sm:$0xff]  ;;  %s378_s30 = scalar_lea.vmem [#allocation2], %s377_s22  ;;  %vm1300_vm10 = vcmask 73728  }
  0x1d   : > { %v394_v9 = vsel %vm391_vm0, %v392_v5, %v393_v6  ;;  %v559_v10 = vsel %vm556_vm2, %v557_v7, %v558_v8  ;;  %v982_v59 = vld [vmem:[%s1909_s6] sm:$0x3]  ;;  %v1400_v61 = vld [vmem:[%s1910_s7 + $0x30] sm:$0xff]  ;;  %v1399_v63 = vld [vmem:[%s1910_s7 + $0x28] sm:$0xff]  ;;  %s1315_s12 = sshll.u32 %s378_s30, 4  ;;  %s1303_s16 = scalar_lea.sflag [#allocation3], %s377_s22  ;;  %s1316_s12 = int_to_ptr.vmem [resolvable:$true] %s1315_s12 }
  0x1e   : > { %1448 = vmatprep.mubr.msk.f32.mxu1 %vm395_vm1, %v394_v9  ;;  %1458 = vmatprep.mubr.msk.f32.mxu0 %vm395_vm1, %v559_v10  ;;  %v1062_v62 = vld [vmem:[%s1910_s7] sm:$0xff]  ;;  %v1223_v5 = vld [vmem:[%s1912_s9 + $0x10] sm:$0xff]  ;;  %s1568_s0 = scalar_lea.vmem %s1316_s12, 16  ;;  %s1572_s21 = sshll.u32 %s1632_s24, 4  ;;  %s1573_s21 = int_to_ptr.vmem [resolvable:$false] %s1572_s21 }
  0x1f   : > { %1449 = vmatmul.mubr.msk.f32.vlgmr.msra.gmra.mxu1 %vm395_vm1, %v393_v6  ;;  %1459 = vmatmul.mubr.msk.f32.vlgmr.msra.gmra.mxu0 %vm395_vm1, %v558_v8  ;;  %v1398_v0 = vld [vmem:[%s1910_s7 + $0x20] sm:$0xff]  ;;  %v1222_v6 = vld [vmem:[%s1912_s9 + $0x8] sm:$0xff]  ;;  %p1569_p11 = scmp.ne.s32.totalorder %s1316_s12, %s1568_s0  ;;  %s1574_s25 = scalar_lea.vmem %s1573_s21, 32 }
  0x20   : > { %1452 = vmatpush3.msra.mxu1 %v386_v1  ;;  %1453 = vmatprep.mubr.msk.f32.mxu1 %vm395_vm1, %v384_v3  ;;  %v1221_v7 = vld [vmem:[%s1912_s9] sm:$0xff]  ;;  %p1575_p0 = scmp.lt.s32.totalorder %s1316_s12, %s1573_s21  ;;  %p1576_p1 = scmp.lt.s32.totalorder %s1574_s25, %s1568_s0 }
  0x21   : > { %1461 = vmatprep.subr.mxu1 %v1630_v11  ;;  %1472 = vmatprep.mubr.msk.f32.mxu0 %vm1631_vm3, %v1630_v11  ;;  %v1061_v8 = vld [vmem:[%s1911_s8] sm:$0x1]  ;;  %p1570_p12 = pnand %p1569_p11, %p1731_p5 }
  0x22   : > { %1469 = vmatpush3.msra.mxu0 %v1388_v34  ;;  %p1577_p2 = por %p1576_p1, %p1575_p0 }
  0x23   : > { %1454 = vmatmul.mubr.msk.f32.vlgmr.msra.gmra.mxu1 %vm395_vm1, %v385_v4  ;;  %1470 = vmatprep.subr.mxu0 %v1630_v11  ;;  %v1224_v4 = vld [vmem:[%s1912_s9 + $0x18] sm:$0xff]  ;;  %p1571_p13 = pneg %p1570_p12 }
  0x24   : > { %1465 = vmatprep.mubr.msk.f32.mxu1 %vm1631_vm3, %v1630_v11  ;;  %1471 = vmatpush3.msra.mxu0 %v1387_v36 }
  0x25   : > { %1482 = vmatprep.subr.mxu0 %v1630_v11  ;;  %p1578_p3 = pnand %p1577_p2, %p1571_p13 }
  0xdf   : > { %v1450_v12 = vpop.f32.mrf.mxu1  ;;  %v1460_v15 = vpop.f32.mrf.mxu0 }
  0xe1   : > { %v466_v13 = vpop.f32.mrf.mxu1  ;;  %v630_v21 = vpop.f32.mrf.mxu0 }
  0xe3   : > { %v1455_v14 = vpop.f32.mrf.mxu1 }
  0xe4   : > { %v551_v16 = vadd.f32 %v1455_v14, %v1450_v12 }
  0xe5   : > { %v545_v18 = vpop.f32.mrf.mxu1 }
  0xe6   : > { %v640_v19 = vadd.f32 %v1460_v15, %v551_v16  ;;  %v546_v20 = vadd.f32 %v545_v18, %v466_v13 }
  0xe8   : > { %v649_v22 = vadd.f32 %v1384_v17, %v640_v19  ;;  %v639_v23 = vadd.f32 %v630_v21, %v546_v20 }
  0xea   : > { %v651_v24 = vmax.f32 %v649_v22, 0.0  ;;  %v648_v25 = vadd.f32 %v1384_v17, %v639_v23 }
  0xec   : > { %v655_v26 = vrot.slane %v651_v24, 1  ;;  %v650_v27 = vmax.f32 %v648_v25, 0.0 }
  0xee   : > { %v660_v28 = vmax.f32 %v651_v24, %v655_v26  ;;  %v654_v29 = vrot.slane %v650_v27, 1 }
  0xf0   : > { %v656_v30 = vsel %vm391_vm0, %v654_v29, %v655_v26  ;;  %1462 = vmatpush3.msk.msra.mxu1 %vm666_vm4, %v660_v28 }
  0xf1   : > { %v659_v31 = vmax.f32 %v650_v27, %v656_v30  ;;  %1463 = vmatprep.subr.mxu1 %v1630_v11 }
  0xf3   : > { %1464 = vmatpush3.msra.mxu1 %v659_v31 }
  0xf4   : > { %1466 = vmatmul.mubr.msk.f32.vlgmr.msra.gmra.mxu1 %vm662_vm5, %v661_v32  ;;  %1475 = vmatprep.subr.mxu1 %v1630_v11 }
  0xf5   : > { %1476 = vmatpush3.msra.mxu1 %v741_v33  ;;  %1479 = vmatprep.mubr.msk.f32.mxu1 %vm1631_vm3, %v1630_v11 }
  0xf6   : > { %1477 = vmatprep.subr.mxu1 %v1630_v11 }
  0xf7   : > { %1478 = vmatpush3.msra.mxu1 %v740_v35 }
  0xf8   : > { %1489 = vmatprep.subr.mxu1 %v1630_v11 }
 0x1b4   : > { %v736_v37 = vpop.f32.mrf.mxu1 }
 0x1b5   : > { %v746_v38 = vrot.slane %v736_v37, 1  ;;  %1480 = vmatmul.mubr.msk.f32.vlgmr.msra.gmra.mxu1 %vm747_vm6, %v736_v37  ;;  %v895_v42 = vrot.slane %v736_v37, 2 }
 0x1b6   : > { %v1467_v40 = vpop.f32.mrf.mxu1  ;;  %1491 = vmatprep.mubr.msk.f32.mxu1 %vm1631_vm3, %v1630_v11 }
 0x1b7   : > { %1473 = vmatmul.mubr.msk.f32.vlgmr.msra.gmra.mxu0 %vm747_vm6, %v746_v38 }
 0x1b8   : > { %1483 = vmatpush3.msra.mxu0 %v1392_v39  ;;  %1486 = vmatprep.mubr.msk.f32.mxu0 %vm1631_vm3, %v1630_v11 }
 0x1b9   : > { %1484 = vmatprep.subr.mxu0 %v1630_v11 }
 0x1ba   : > { %1485 = vmatpush3.msra.mxu0 %v1391_v41 }
 0x1bb   : > { %1487 = vmatmul.mubr.msk.f32.vlgmr.msra.gmra.mxu0 %vm747_vm6, %v895_v42  ;;  %1494 = vmatprep.subr.mxu0 %v1630_v11 }
 0x1bc   : > { %1502 = vmatprep.mubr.msk.f32.mxu0 %vm1631_vm3, %v1630_v11  ;;  %1495 = vmatpush3.msra.mxu0 %v1065_v43 }
 0x1bd   : > { %1496 = vmatprep.subr.mxu0 %v1630_v11 }
 0x1be   : > { %1497 = vmatpush3.msra.mxu0 %v1064_v44 }
 0x1bf   : > { %1498 = vmatprep.subr.mxu0 %v1630_v11 }
 0x1c0   : > { %1499 = vmatpush3.msra.mxu0 %v1063_v45 }
 0x1c1   : > { %1500 = vmatprep.subr.mxu0 %v1630_v11 }
 0x1c2   : > { %1501 = vmatpush3.msra.mxu0 %v1062_v62 }
 0x1c3   : > { %1516 = vmatprep.subr.mxu0 %v1630_v11 }
 0x275   : > { %v888_v46 = vpop.f32.mrf.mxu1 }
 0x277   : > { %v816_v47 = vpop.f32.mrf.mxu0  ;;  %v1481_v48 = vpop.f32.mrf.mxu1 }
 0x278   : > { %v889_v50 = vadd.f32 %v888_v46, %v816_v47 }
 0x279   : > { %v1474_v49 = vpop.f32.mrf.mxu0 }
 0x27b   : > { %v964_v51 = vpop.f32.mrf.mxu0 }
 0x27c   : > { %v968_v53 = vadd.f32 %v964_v51, %v889_v50 }
 0x27d   : > { %v1488_v54 = vpop.f32.mrf.mxu0 }
 0x27e   : > { %v976_v55 = vadd.f32 %v1394_v52, %v968_v53 }
 0x280   : > { %v977_v56 = vmax.f32 %v976_v55, 0.0 }
 0x282   : > { %v979_v57 = vrot.slane %v977_v56, 1 }
 0x284   : > { %v981_v58 = vmax.f32 %v977_v56, %v979_v57 }
 0x286   : > { %1490 = vmatpush3.msk.msra.mxu1 %vm987_vm7, %v981_v58 }
 0x287   : > { %1492 = vmatmul.mubr.msk.f32.vlgmr.msra.gmra.mxu1 %vm983_vm8, %v982_v59  ;;  %1505 = vmatprep.subr.mxu1 %v1630_v11 }
 0x288   : > { %1506 = vmatpush3.msra.mxu1 %v1401_v60  ;;  %1513 = vmatprep.mubr.msk.f32.mxu1 %vm1631_vm3, %v1630_v11 }
 0x289   : > { %1507 = vmatprep.subr.mxu1 %v1630_v11 }
 0x28a   : > { %1508 = vmatpush3.msra.mxu1 %v1400_v61 }
 0x28b   : > { %1509 = vmatprep.subr.mxu1 %v1630_v11 }
 0x28c   : > { %1510 = vmatpush3.msra.mxu1 %v1399_v63 }
 0x28d   : > { %1511 = vmatprep.subr.mxu1 %v1630_v11 }
 0x28e   : > { %1512 = vmatpush3.msra.mxu1 %v1398_v0 }
 0x347   : > { %v1057_v1 = vpop.f32.mrf.mxu1 }
 0x348   : > { %v1146_v2 = vrot.slane %v1057_v1, 1  ;;  %1503 = vmatmul.mubr.msk.f32.vlgmr.msra.gmra.mxu0 %vm1066_vm9, %v1057_v1 }
 0x349   : > { %v1493_v3 = vpop.f32.mrf.mxu1  ;;  %1524 = vmatprep.mubr.msk.f32.mxu0 %vm1631_vm3, %v1630_v11  ;;  %1517 = vmatpush3.msra.mxu0 %v1224_v4 }
 0x34a   : > { %1514 = vmatmul.mubr.msk.f32.vlgmr.msra.gmra.mxu1 %vm1066_vm9, %v1146_v2  ;;  %1518 = vmatprep.subr.mxu0 %v1630_v11 }
 0x34b   : > { %1519 = vmatpush3.msra.mxu0 %v1223_v5 }
 0x34c   : > { %1520 = vmatprep.subr.mxu0 %v1630_v11 }
 0x34d   : > { %1521 = vmatpush3.msra.mxu0 %v1222_v6 }
 0x34e   : > { %1522 = vmatprep.subr.mxu0 %v1630_v11  ;;  %v1225_v11 = vld [vmem:[%s1913_s10] sm:$0x1] }
 0x34f   : > { %1523 = vmatpush3.msra.mxu0 %v1221_v7 }
 0x408   : > { %v1136_v9 = vpop.f32.mrf.mxu0 }
 0x409   : > { %v1140_v10 = vadd.f32 %v1136_v9, %v1061_v8 }
 0x40a   : > { %v1504_v12 = vpop.f32.mrf.mxu0  ;;  %v1215_v13 = vpop.f32.mrf.mxu1 }
 0x40b   : > { %v1219_v14 = vadd.f32 %v1215_v13, %v1140_v10 }
 0x40c   : > { %v1515_v15 = vpop.f32.mrf.mxu1 }
 0x40d   : > { %v1220_v16 = vmax.f32 %v1219_v14, 0.0 }
 0x40f   : > { %1525 = vmatmul.mubr.msk.f32.vlgmr.msra.gmra.mxu0 %vm1066_vm9, %v1220_v16 }
 0x4cf   : > { %v1295_v17 = vpop.f32.mrf.mxu0 }
 0x4d0   : > { %v1296_v18 = vadd.f32 %v1295_v17, %v1225_v11 }
 0x4d1   : > { %v1526_v19 = vpop.f32.mrf.mxu0 }
 0x4d2   : > { %v1299_v20 = vmax.f32 %v1296_v18, 0.0 }
 0x4d4   : > { %1301 = vst.msk [vmem:[%s378_s30] sm:$0x1] %vm1300_vm10, %v1299_v20 }
 0x4d5   : > { %1581 = shalt.err (!%p1578_p3)
}
 0x4d6   : > { %s1582_s1 = scalar_lea.hbm %s1313_s15, 16  ;;  %s1586_s30 = scalar_lea.hbm %s1914_s11, 32 }
 0x4d7   : > { %p1583_p4 = scmp.ne.s32.totalorder %s1313_s15, %s1582_s1  ;;  %p1587_p9 = scmp.lt.s32.totalorder %s1313_s15, %s1914_s11 }
 0x4d8   : > { %p1588_p10 = scmp.lt.s32.totalorder %s1586_s30, %s1582_s1 }
 0x4d9   : > { %p1584_p7 = pnand %p1583_p4, %p1731_p5 }
 0x4da   : > { %p1589_p11 = por %p1588_p10, %p1587_p9 }
 0x4db   : > { %p1585_p8 = pneg %p1584_p7 }
 0x4dd   : > { %p1590_p12 = pnand %p1589_p11, %p1585_p8 }
 0x4df   : > { %1593 = shalt.err (!%p1590_p12)
}
 0x4e0   : > { %1527 = dma.vmem_to_hbm [thread:$0]  (%p1731_p5), %s1316_s12, 16, %s1313_s15, %s1303_s16  }
 0x4e1 PF: > { %p1533_p13 = scmp.ge.s32.totalorder %s1628_s20, 2  ;;  %s1327_s0 = sand.u32 1, %s1616_s17  }
 0x4e2   : > { %s1328_s24 = scalar_lea.sflag [#allocation3], %s1327_s0 }
 0x4e3   : > { %p1530_p0 = pnand %p1533_p13, %p1735_p6 }
 0x4e5   : > { %p1531_p1 = pneg %p1530_p0 }
 0x4e7   : > { %1611 = dma.done.wait (%p1531_p1), %s1328_s24, 16  }
 0x4e8   : > { %1613 = vsyncadd (%p1531_p1), %s1328_s24, 4294967280  ;;  %p21_p2 = scmp.ge.s32.totalorder %s1718_s23, 4   ;;  %s1921_s17 = smov %s1620_s18 }
 0x4e9   : > { %s1922_s18 = smov %s1624_s19  ;;  %s1923_s19 = smov %s1729_s26 }
 0x4ea   : > { %s1924_s20 = smov %s1718_s23  ;;  %23 = sbr.rel (!%p21_p2) target bundleno = 6 (0x6), region = 104 }
 0x4ef   :  { %1332 = vsyncpa [#allocation3], 1 }
 0x4f0   :  { %1334 = vsyncpa [#allocation3 + $0x1], 1 }

</bundles_post_ra>
